<compile_context>
chip_gen: v5e
topology: v5e:2x2
jax: 0.10.0
libtpu: 0.0.40
codegen_flags: <defaults>
</compile_context>

<pallas_src>
import jax
import jax.numpy as jnp
from jax.experimental import pallas as pl
from jax.experimental.pallas import tpu as pltpu


def _multi_input_kernel(p_ref, f_ref, w_img_ref, w2_ref, b_ref, o_ref):
    """One (batch, row-tile) block per grid step.

    p_ref     : (1, TR, 32)  im2col patches of the upsampled image (27 -> 32)
    f_ref     : (1, TR, C)   features
    w_img_ref : (32, C)      folded weight: (conv_in * bn_scale) @ W1
    w2_ref    : (C, C)       conv_out weight acting on the feature branch
    b_ref     : (1, C)  f32  folded bias: bn_shift @ W1 + conv_out bias
    o_ref     : (1, TR, C)   output
    """
    out = (jnp.dot(p_ref[0], w_img_ref[...], preferred_element_type=jnp.float32)
           + jnp.dot(f_ref[0], w2_ref[...], preferred_element_type=jnp.float32)
           + b_ref[...])
    o_ref[0] = out.astype(o_ref.dtype)


def _bilinear_matrix(in_size, out_size):
    """Row-stochastic (out_size, in_size) matrix for align_corners=True resize."""
    if out_size == 1:
        src = jnp.zeros((1,), jnp.float32)
    else:
        src = jnp.arange(out_size, dtype=jnp.float32) * (in_size - 1) / (out_size - 1)
    i0 = jnp.clip(jnp.floor(src), 0, max(in_size - 2, 0)).astype(jnp.int32)
    frac = src - i0.astype(jnp.float32)
    lo = jax.nn.one_hot(i0, in_size, dtype=jnp.float32) * (1.0 - frac)[:, None]
    hi = jax.nn.one_hot(jnp.minimum(i0 + 1, in_size - 1), in_size,
                        dtype=jnp.float32) * frac[:, None]
    return lo + hi


def _round_up(x, m):
    return -(-x // m) * m


def _choose_tr(HW, row_tile, min_tiles):
    """Row tile: multiple of 8, <= row_tile, preferring an exact divisor of HW
    (no row padding) that still yields >= min_tiles tiles (megacore balance)."""
    cap = _round_up(max(8, min(row_tile, HW)), 8)
    best = None
    if HW % 8 == 0:
        for t in range(8, cap + 1, 8):
            if HW % t == 0 and HW // t >= min_tiles:
                best = t
    if best is not None:
        return best, HW
    tr = _round_up(max(8, min(row_tile, -(-HW // min_tiles))), 8)
    return tr, _round_up(HW, tr)


def multi_input_forward_nhwc(img_nhwc, feat_nhwc, params, factor, *,
                             mxu_dtype=jnp.bfloat16, out_dtype=None,
                             row_tile=1024):
    """img: (N, H, W, 3), features: (N, H*f, W*f, C) -> (N, H*f, W*f, C).

    Params use PyTorch layouts: conv_in_w (C,3,3,3), conv_out_w (C,2C,1,1),
    plus conv_in_b / bn_gamma / bn_beta / bn_mean / bn_var / conv_out_b (C,).
    """
    eps = 1e-5
    if out_dtype is None:
        out_dtype = mxu_dtype           # bf16 output on the fast path (HBM-bound)
    N, Hin, Win, _ = img_nhwc.shape
    C = feat_nhwc.shape[-1]
    Hf, Wf = Hin * factor, Win * factor
    assert feat_nhwc.shape == (N, Hf, Wf, C)
    HW = Hf * Wf
    KP = 32                             # 3*3*3 = 27 im2col taps, padded to 32

    # ---- parameter folding (PyTorch OIHW -> fused matrices), all in f32 ----
    w3 = jnp.transpose(params['conv_in_w'], (2, 3, 1, 0)).reshape(27, C)   # (kh,kw,cin,cout)
    w_out = params['conv_out_w'].reshape(C, 2 * C).T                       # (2C, C), rows 0..C-1 = BN branch
    scale = params['bn_gamma'] / jnp.sqrt(params['bn_var'] + eps)
    shift = params['bn_beta'] + (params['conv_in_b'] - params['bn_mean']) * scale
    w1, w2 = w_out[:C], w_out[C:]
    w_img = (w3 * scale[None, :]) @ w1                                     # fold BN + W1
    b_fold = shift @ w1 + params['conv_out_b']
    w_img = jnp.pad(w_img, ((0, KP - 27), (0, 0))).astype(mxu_dtype)
    w2 = w2.astype(mxu_dtype)
    b_fold = b_fold.reshape(1, C).astype(jnp.float32)

    # ---- glue: bilinear upsample (align_corners=True) + im2col, NHWC ----
    Mh = _bilinear_matrix(Hin, Hf)
    Mw = _bilinear_matrix(Win, Wf)
    resized = jnp.einsum('ah,bw,nhwc->nabc', Mh, Mw, img_nhwc).astype(mxu_dtype)
    xp = jnp.pad(resized, ((0, 0), (1, 1), (1, 1), (0, 0)))                # 'same' zero pad
    patches = jnp.stack(
        [xp[:, dy:dy + Hf, dx:dx + Wf, :] for dy in range(3) for dx in range(3)],
        axis=3).reshape(N, HW, 27)

    # ---- row tiling + VMEM budget ----
    min_tiles = 1 if N >= 2 else 2      # keep both v7x TensorCores busy
    itm = jnp.dtype(mxu_dtype).itemsize
    ito = jnp.dtype(out_dtype).itemsize
    w_bytes = (KP * C + C * C) * itm + C * 4
    budget = 44 << 20                   # stay well inside v7x's 64 MiB VMEM
    while True:
        TR, HWp = _choose_tr(HW, row_tile, min_tiles)
        blk_bytes = TR * (KP * itm + C * itm + C * ito)
        vmem_need = 2 * blk_bytes + 2 * w_bytes     # double-buffered blocks + weights
        if vmem_need <= budget or TR <= 8:
            break
        row_tile = max(TR // 2, 8)
    n_row_tiles = HWp // TR
    vmem_limit = min(max(int(vmem_need * 3 // 2) + (2 << 20), 16 << 20), 48 << 20)

    # Single merged pad (rows + 27->32); no channel padding anywhere.
    patches = jnp.pad(patches, ((0, 0), (0, HWp - HW), (0, KP - 27)))
    feat_flat = feat_nhwc.reshape(N, HW, C).astype(mxu_dtype)
    if HWp != HW:
        feat_flat = jnp.pad(feat_flat, ((0, 0), (0, HWp - HW), (0, 0)))

    out_flat = pl.pallas_call(
        _multi_input_kernel,
        out_shape=jax.ShapeDtypeStruct((N, HWp, C), out_dtype),
        grid_spec=pltpu.PrefetchScalarGridSpec(
            num_scalar_prefetch=0,
            grid=(N, n_row_tiles),
            in_specs=[
                pl.BlockSpec((1, TR, KP), lambda n, t: (n, t, 0)),   # patches
                pl.BlockSpec((1, TR, C), lambda n, t: (n, t, 0)),    # features
                pl.BlockSpec((KP, C), lambda n, t: (0, 0)),          # W_img (invariant)
                pl.BlockSpec((C, C), lambda n, t: (0, 0)),           # W2    (invariant)
                pl.BlockSpec((1, C), lambda n, t: (0, 0)),           # b_fold(invariant)
            ],
            out_specs=pl.BlockSpec((1, TR, C), lambda n, t: (n, t, 0)),
        ),
        compiler_params=pltpu.CompilerParams(
            dimension_semantics=("parallel", "parallel"),
            vmem_limit_bytes=vmem_limit),
    )(patches, feat_flat, w_img, w2, b_fold)

    if HWp != HW:
        out_flat = out_flat[:, :HW, :]
    return out_flat.reshape(N, Hf, Wf, C)


def multi_input_forward(img_nchw, feat_nchw, params, factor, **kw):
    """NCHW compatibility wrapper matching the PyTorch interface.

    Production callers should stay NHWC end-to-end and call
    multi_input_forward_nhwc directly; these transposes exist only to match
    the PyTorch NCHW convention.
    """
    img_nhwc = jnp.transpose(img_nchw, (0, 2, 3, 1))
    feat_nhwc = jnp.transpose(feat_nchw, (0, 2, 3, 1))
    out_nhwc = multi_input_forward_nhwc(img_nhwc, feat_nhwc, params, factor, **kw)
    return jnp.transpose(out_nhwc, (0, 3, 1, 2))


def _reference(img_nchw, feat_nchw, params, factor):
    """Plain-JAX f32 reference mirroring the PyTorch module (eval-mode BN)."""
    eps = 1e-5
    N, _, Hin, Win = img_nchw.shape
    Hf, Wf = Hin * factor, Win * factor
    Mh = _bilinear_matrix(Hin, Hf)
    Mw = _bilinear_matrix(Win, Wf)
    up = jnp.einsum('ah,bw,nchw->ncab', Mh, Mw, img_nchw)
    x = jax.lax.conv_general_dilated(
        up, params['conv_in_w'], (1, 1), 'SAME',
        dimension_numbers=('NCHW', 'OIHW', 'NCHW')) \
        + params['conv_in_b'][None, :, None, None]
    x = (x - params['bn_mean'][None, :, None, None]) \
        / jnp.sqrt(params['bn_var'][None, :, None, None] + eps) \
        * params['bn_gamma'][None, :, None, None] \
        + params['bn_beta'][None, :, None, None]
    cat = jnp.concatenate([x, feat_nchw], axis=1)
    out = jax.lax.conv_general_dilated(
        cat, params['conv_out_w'], (1, 1), 'VALID',
        dimension_numbers=('NCHW', 'OIHW', 'NCHW')) \
        + params['conv_out_b'][None, :, None, None]
    return out


if __name__ == "__main__":
    N, C, Hin, Win, factor = 2, 4, 8, 8, 2
    Hf, Wf = Hin * factor, Win * factor

    key = jax.random.PRNGKey(0)
    ks = jax.random.split(key, 10)

    # Parameters in PyTorch layouts (as they would come out of a state_dict).
    params = {
        'conv_in_w':  0.1 * jax.random.normal(ks[0], (C, 3, 3, 3), jnp.float32),     # OIHW
        'conv_in_b':  0.1 * jax.random.normal(ks[1], (C,), jnp.float32),
        'bn_gamma':   1.0 + 0.1 * jax.random.normal(ks[2], (C,), jnp.float32),
        'bn_beta':    0.1 * jax.random.normal(ks[3], (C,), jnp.float32),
        'bn_mean':    0.1 * jax.random.normal(ks[4], (C,), jnp.float32),
        'bn_var':     0.5 + 0.5 * jnp.abs(jax.random.normal(ks[5], (C,), jnp.float32)),
        'conv_out_w': 0.1 * jax.random.normal(ks[6], (C, 2 * C, 1, 1), jnp.float32),  # OIHW
        'conv_out_b': 0.1 * jax.random.normal(ks[7], (C,), jnp.float32),
    }

    img = jax.random.normal(ks[8], (N, 3, Hin, Win), jnp.float32)
    features = jax.random.normal(ks[9], (N, C, Hf, Wf), jnp.float32)

    ref = _reference(img, features, params, factor)

    # Exact-precision path (f32 MXU operands + f32 output): tight check.
    out_f32 = multi_input_forward(img, features, params, factor,
                                  mxu_dtype=jnp.float32, out_dtype=jnp.float32)
    out_f32 = jax.block_until_ready(out_f32)
    assert out_f32.shape == (N, C, Hf, Wf)
    err32 = jnp.max(jnp.abs(out_f32 - ref))
    assert jnp.allclose(out_f32, ref, atol=1e-4, rtol=1e-4), \
        f"f32 max abs err {err32}"

    # Default fast path: bf16 MXU operands, f32 accumulation, bf16 output.
    out = multi_input_forward(img, features, params, factor)
    out = jax.block_until_ready(out)
    assert out.shape == (N, C, Hf, Wf)
    assert out.dtype == jnp.bfloat16
    out_f = out.astype(jnp.float32)
    errbf = jnp.max(jnp.abs(out_f - ref))
    assert jnp.allclose(out_f, ref, atol=3e-2, rtol=3e-2), \
        f"bf16 max abs err {errbf}"

    print("KERNEL_OK")
</pallas_src>

<mosaic_0001>
module attributes {stable_mosaic.version = 11 : i64} {
  func.func @_multi_input_kernel(%arg0: i32, %arg1: i32, %arg2: memref<1x256x32xf32, #tpu.memory_space<vmem>>, %arg3: memref<1x256x4xf32, #tpu.memory_space<vmem>>, %arg4: memref<32x4xf32, #tpu.memory_space<vmem>>, %arg5: memref<4x4xf32, #tpu.memory_space<vmem>>, %arg6: memref<1x4xf32, #tpu.memory_space<vmem>>, %arg7: memref<1x256x4xf32, #tpu.memory_space<vmem>>) attributes {dimension_semantics = [#tpu.dimension_semantics<parallel>, #tpu.dimension_semantics<parallel>], iteration_bounds = array<i64: 2, 1>, scalar_prefetch = 0 : i64, scratch_operands = 0 : i64, tpu.core_type = #tpu.core_type<tc>, window_params = [{transform_indices = @transform_0, window_bounds = array<i64: 1, 256, 32>}, {transform_indices = @transform_1, window_bounds = array<i64: 1, 256, 4>}, {pipeline_mode = #tpu.pipeline_mode<synchronous>, transform_indices = @transform_2, window_bounds = array<i64: 32, 4>}, {pipeline_mode = #tpu.pipeline_mode<synchronous>, transform_indices = @transform_3, window_bounds = array<i64: 4, 4>}, {pipeline_mode = #tpu.pipeline_mode<synchronous>, transform_indices = @transform_4, window_bounds = array<i64: 1, 4>}, {transform_indices = @transform_5, window_bounds = array<i64: 1, 256, 4>}]} {
    %c0 = arith.constant 0 : index
    %c0_0 = arith.constant 0 : index
    %c0_1 = arith.constant 0 : index
    %0 = vector.load %arg2[%c0, %c0_0, %c0_1] : memref<1x256x32xf32, #tpu.memory_space<vmem>>, vector<1x256x32xf32>
    %1 = vector.shape_cast %0 : vector<1x256x32xf32> to vector<256x32xf32>
    %c0_2 = arith.constant 0 : index
    %c0_3 = arith.constant 0 : index
    %2 = vector.load %arg4[%c0_2, %c0_3] : memref<32x4xf32, #tpu.memory_space<vmem>>, vector<32x4xf32>
    %cst = arith.constant dense<0.000000e+00> : vector<256x4xf32>
    %3 = tpu.matmul %1, %2, %cst {dimension_numbers = #tpu.dot_dimension_numbers<[1], [0], [0], [1], [0, 0, 1, 1], [], []>} : vector<256x32xf32>, vector<32x4xf32>, vector<256x4xf32> -> vector<256x4xf32>
    %c0_4 = arith.constant 0 : index
    %c0_5 = arith.constant 0 : index
    %c0_6 = arith.constant 0 : index
    %4 = vector.load %arg3[%c0_4, %c0_5, %c0_6] : memref<1x256x4xf32, #tpu.memory_space<vmem>>, vector<1x256x4xf32>
    %5 = vector.shape_cast %4 : vector<1x256x4xf32> to vector<256x4xf32>
    %c0_7 = arith.constant 0 : index
    %c0_8 = arith.constant 0 : index
    %6 = vector.load %arg5[%c0_7, %c0_8] : memref<4x4xf32, #tpu.memory_space<vmem>>, vector<4x4xf32>
    %cst_9 = arith.constant dense<0.000000e+00> : vector<256x4xf32>
    %7 = tpu.matmul %5, %6, %cst_9 {dimension_numbers = #tpu.dot_dimension_numbers<[1], [0], [0], [1], [0, 0, 1, 1], [], []>} : vector<256x4xf32>, vector<4x4xf32>, vector<256x4xf32> -> vector<256x4xf32>
    %8 = arith.addf %3, %7 : vector<256x4xf32>
    %c0_10 = arith.constant 0 : index
    %c0_11 = arith.constant 0 : index
    %9 = vector.load %arg6[%c0_10, %c0_11] : memref<1x4xf32, #tpu.memory_space<vmem>>, vector<1x4xf32>
    %10 = vector.broadcast %9 : vector<1x4xf32> to vector<256x4xf32>
    %11 = arith.addf %8, %10 : vector<256x4xf32>
    %c0_12 = arith.constant 0 : index
    %c0_13 = arith.constant 0 : index
    %c0_14 = arith.constant 0 : index
    %12 = vector.load %arg7[%c0_12, %c0_13, %c0_14] : memref<1x256x4xf32, #tpu.memory_space<vmem>>, vector<1x256x4xf32>
    %13 = vector.shape_cast %12 : vector<1x256x4xf32> to vector<256x4xf32>
    %14 = vector.shape_cast %11 : vector<256x4xf32> to vector<1x256x4xf32>
    tpu.vector_store %arg7[%c0_12, %c0_13, %c0_14], %14 {strides = array<i32>} : memref<1x256x4xf32, #tpu.memory_space<vmem>>, vector<1x256x4xf32>,
    return
  }
  func.func @transform_0(%arg0: i32, %arg1: i32) -> (i32, i32, i32) {
    %c0_i32 = arith.constant 0 : i32
    %c0_i32_0 = arith.constant 0 : i32
    return %arg0, %arg1, %c0_i32 : i32, i32, i32
  }
  func.func @transform_1(%arg0: i32, %arg1: i32) -> (i32, i32, i32) {
    %c0_i32 = arith.constant 0 : i32
    %c0_i32_0 = arith.constant 0 : i32
    return %arg0, %arg1, %c0_i32 : i32, i32, i32
  }
  func.func @transform_2(%arg0: i32, %arg1: i32) -> (i32, i32) {
    %c0_i32 = arith.constant 0 : i32
    %c0_i32_0 = arith.constant 0 : i32
    %c0_i32_1 = arith.constant 0 : i32
    return %c0_i32, %c0_i32_0 : i32, i32
  }
  func.func @transform_3(%arg0: i32, %arg1: i32) -> (i32, i32) {
    %c0_i32 = arith.constant 0 : i32
    %c0_i32_0 = arith.constant 0 : i32
    %c0_i32_1 = arith.constant 0 : i32
    return %c0_i32, %c0_i32_0 : i32, i32
  }
  func.func @transform_4(%arg0: i32, %arg1: i32) -> (i32, i32) {
    %c0_i32 = arith.constant 0 : i32
    %c0_i32_0 = arith.constant 0 : i32
    %c0_i32_1 = arith.constant 0 : i32
    return %c0_i32, %c0_i32_0 : i32, i32
  }
  func.func @transform_5(%arg0: i32, %arg1: i32) -> (i32, i32, i32) {
    %c0_i32 = arith.constant 0 : i32
    %c0_i32_0 = arith.constant 0 : i32
    return %arg0, %arg1, %c0_i32 : i32, i32, i32
  }
}

</mosaic_0001>

<bundles_post_ra>
// kernel: tpu_custom_call.1
= control target key start
LH: loop header
LB: loop body
LE: loop exit
PB: predicated region body
PF: predicated region fallthrough
CT: control target
= control target key end

     0   :  { %s1131_s18 = smov 0   ;;  %s1133_s19 = smov 0   ;;  %s1425_s0 = inlined_call_operand.vmem [shape: f32[2,256,32], index: 0, kind: input, shape index: {}]   ;;  %s1426_s1 = inlined_call_operand.vmem [shape: f32[2,256,4], index: 1, kind: input, shape index: {}]   ;;  %s1427_s2 = inlined_call_operand.vmem [shape: f32[32,4], index: 2, kind: input, shape index: {}]   ;;  %s1428_s3 = inlined_call_operand.vmem [shape: f32[4,4], index: 3, kind: input, shape index: {}]   ;;  %s1429_s4 = inlined_call_operand.vmem [shape: f32[1,4], index: 4, kind: input, shape index: {}]   ;;  %s1430_s5 = inlined_call_operand.vmem [shape: f32[2,256,4], index: 5, kind: output, shape index: {}]  }
   0x1   :  { %s1135_s20 = smov 0  }
   0x2 LB: > { %s27_s21 = sadd.s32 1, %s1095_s19  ;;  %p970_p0 = scmp.ge.s32.totalorder %s1099_s20, 1  ;;  %s1099_s20 = sphi %s1135_s20, %s15_s20   ;;  %s1095_s19 = sphi %s1133_s19, %s1432_s19   ;;  %s1091_s18 = sphi %s1131_s18, %s1431_s18  }
   0x3   : > { %p29_p1 = scmp.ge.s32.totalorder %s27_s21, 2  ;;  %p225_p2 = scmp.lt.s32.totalorder %s1099_s20, 3 }
   0x5   : > { %s1434_s21 = smov (%p29_p1, %s27_s21), 0  ;;  %p226_p3 = pnand %p970_p0, %p225_p2 }
   0x6   : > { %p271_p4 = scmp.lt.s32.totalorder (!%p226_p3), %s1091_s18, 1 }
   0x7   : > { %229 = sbr.rel (%p226_p3) target bundleno = 277 (0x115), region = 40 }
   0xc   : > { %v335_v0 = vld [vmem:[%s1427_s2 + $0x18] sm:$0xff]  ;;  %v334_v1 = vld [vmem:[%s1427_s2 + $0x10] sm:$0xff]  ;;  %vm466_vm0 = vcmask 1043456   ;;  %v368_v2 = vld [vmem:[%s1428_s3] sm:$0xf]  ;;  %s1436_s18 = smov (!%p271_p4, %s1091_s18), 1 }
   0xd   : > { %692 = vmatpush.msra.mxu1 %v335_v0  ;;  %1048 = vmatpush.msra.mxu2 %v335_v0  ;;  %v333_v3 = vld [vmem:[%s1427_s2 + $0x8] sm:$0xff]  ;;  %s1161_s30 = sshll.u32 %s1436_s18, 8  ;;  %vm369_vm1 = vcmask 31744   ;;  %v332_v4 = vld [vmem:[%s1427_s2] sm:$0xff]  ;;  %vm583_vm2 = vcmask 261120  }
   0xe   : > { %977 = vmatpush.msk.msra.mxu0 %vm466_vm0, %v368_v2  ;;  %1047 = vmatpush.msk.msra.mxu3 %vm466_vm0, %v368_v2  ;;  %s1170_s10 = scalar_lea.vmem %s1426_s1, %s1161_s30  ;;  %s1177_s13 = scalar_lea.vmem %s1425_s0, %s1161_s30 }
   0xf   : > { %693 = vmatpush.msra.mxu1 %v334_v1  ;;  %1049 = vmatpush.msra.mxu2 %v334_v1  ;;  %v336_v5 = vld [vmem:[%s1170_s10] sm:$0xff]  ;;  %v353_v6 = vld [vmem:[%s1170_s10 + $0x88] sm:$0xff]  ;;  %v354_v12 = vld [vmem:[%s1170_s10 + $0x90] sm:$0xff]  ;;  %s1314_s18 = scalar_lea.vmem %s1430_s5, %s1161_s30 }
  0x10   : > { %978 = vmatmul.msk.f32.vlgmr.msra.gmra.mxu0 %vm369_vm1, %v336_v5  ;;  %v300_v7 = vld [vmem:[%s1177_s13] sm:$0xff]  ;;  %995 = vmatmul.msk.f32.vlgmr.msra.gmra.mxu3 %vm369_vm1, %v353_v6  ;;  %v337_v9 = vld [vmem:[%s1170_s10 + $0x8] sm:$0xff]  ;;  %v338_v13 = vld [vmem:[%s1170_s10 + $0x10] sm:$0xff] }
  0x11   : > { %694 = vmatpush.msra.mxu1 %v333_v3  ;;  %1050 = vmatpush.msra.mxu2 %v333_v3  ;;  %v316_v8 = vld [vmem:[%s1177_s13 + $0x80] sm:$0xff]  ;;  %v301_v10 = vld [vmem:[%s1177_s13 + $0x8] sm:$0xff]  ;;  %v302_v14 = vld [vmem:[%s1177_s13 + $0x10] sm:$0xff] }
  0x12   : > { %v317_v11 = vld [vmem:[%s1177_s13 + $0x88] sm:$0xff]  ;;  %v318_v15 = vld [vmem:[%s1177_s13 + $0x90] sm:$0xff]  ;;  %v355_v16 = vld [vmem:[%s1170_s10 + $0x98] sm:$0xff] }
  0x13   : > { %695 = vmatpush.msra.mxu1 %v332_v4  ;;  %1051 = vmatpush.msra.mxu2 %v332_v4  ;;  %v339_v17 = vld [vmem:[%s1170_s10 + $0x18] sm:$0xff]  ;;  %v356_v20 = vld [vmem:[%s1170_s10 + $0xa0] sm:$0xff]  ;;  %v357_v24 = vld [vmem:[%s1170_s10 + $0xa8] sm:$0xff] }
  0x14   : > { %1010 = vmatmul.msk.f32.vlgmr.msra.gmra.mxu1 %vm583_vm2, %v300_v7  ;;  %1026 = vmatmul.msk.f32.vlgmr.msra.gmra.mxu2 %vm583_vm2, %v316_v8  ;;  %v303_v18 = vld [vmem:[%s1177_s13 + $0x18] sm:$0xff]  ;;  %v340_v21 = vld [vmem:[%s1170_s10 + $0x20] sm:$0xff]  ;;  %v341_v25 = vld [vmem:[%s1170_s10 + $0x28] sm:$0xff] }
  0x15   : > { %v319_v19 = vld [vmem:[%s1177_s13 + $0x98] sm:$0xff]  ;;  %v304_v22 = vld [vmem:[%s1177_s13 + $0x20] sm:$0xff]  ;;  %v305_v26 = vld [vmem:[%s1177_s13 + $0x28] sm:$0xff] }
  0x16   : > { %v320_v23 = vld [vmem:[%s1177_s13 + $0xa0] sm:$0xff]  ;;  %v321_v27 = vld [vmem:[%s1177_s13 + $0xa8] sm:$0xff]  ;;  %v358_v28 = vld [vmem:[%s1170_s10 + $0xb0] sm:$0xff] }
  0x17   : > { %v342_v29 = vld [vmem:[%s1170_s10 + $0x30] sm:$0xff]  ;;  %v359_v32 = vld [vmem:[%s1170_s10 + $0xb8] sm:$0xff]  ;;  %v360_v36 = vld [vmem:[%s1170_s10 + $0xc0] sm:$0xff] }
  0x18   : > { %979 = vmatmul.msk.f32.gmra.mxu0 %vm369_vm1, %v337_v9  ;;  %996 = vmatmul.msk.f32.gmra.mxu3 %vm369_vm1, %v354_v12  ;;  %v306_v30 = vld [vmem:[%s1177_s13 + $0x30] sm:$0xff]  ;;  %v343_v33 = vld [vmem:[%s1170_s10 + $0x38] sm:$0xff]  ;;  %v344_v37 = vld [vmem:[%s1170_s10 + $0x40] sm:$0xff] }
  0x19   : > { %v322_v31 = vld [vmem:[%s1177_s13 + $0xb0] sm:$0xff]  ;;  %v307_v34 = vld [vmem:[%s1177_s13 + $0x38] sm:$0xff]  ;;  %v308_v38 = vld [vmem:[%s1177_s13 + $0x40] sm:$0xff] }
  0x1a   : > { %v323_v35 = vld [vmem:[%s1177_s13 + $0xb8] sm:$0xff]  ;;  %v324_v39 = vld [vmem:[%s1177_s13 + $0xc0] sm:$0xff]  ;;  %v361_v40 = vld [vmem:[%s1170_s10 + $0xc8] sm:$0xff] }
  0x1b   : > { %v345_v41 = vld [vmem:[%s1170_s10 + $0x48] sm:$0xff]  ;;  %v362_v44 = vld [vmem:[%s1170_s10 + $0xd0] sm:$0xff]  ;;  %v363_v48 = vld [vmem:[%s1170_s10 + $0xd8] sm:$0xff] }
  0x1c   : > { %1011 = vmatmul.msk.f32.gmra.mxu1 %vm583_vm2, %v301_v10  ;;  %1027 = vmatmul.msk.f32.gmra.mxu2 %vm583_vm2, %v317_v11  ;;  %v309_v42 = vld [vmem:[%s1177_s13 + $0x48] sm:$0xff]  ;;  %v346_v45 = vld [vmem:[%s1170_s10 + $0x50] sm:$0xff]  ;;  %v347_v49 = vld [vmem:[%s1170_s10 + $0x58] sm:$0xff] }
  0x1d   : > { %v325_v43 = vld [vmem:[%s1177_s13 + $0xc8] sm:$0xff]  ;;  %v310_v46 = vld [vmem:[%s1177_s13 + $0x50] sm:$0xff]  ;;  %v311_v50 = vld [vmem:[%s1177_s13 + $0x58] sm:$0xff] }
  0x1e   : > { %v326_v47 = vld [vmem:[%s1177_s13 + $0xd0] sm:$0xff]  ;;  %v327_v51 = vld [vmem:[%s1177_s13 + $0xd8] sm:$0xff]  ;;  %v364_v52 = vld [vmem:[%s1170_s10 + $0xe0] sm:$0xff] }
  0x1f   : > { %v348_v53 = vld [vmem:[%s1170_s10 + $0x60] sm:$0xff]  ;;  %v365_v56 = vld [vmem:[%s1170_s10 + $0xe8] sm:$0xff]  ;;  %v366_v60 = vld [vmem:[%s1170_s10 + $0xf0] sm:$0xff] }
  0x20   : > { %980 = vmatmul.msk.f32.gmra.mxu0 %vm369_vm1, %v338_v13  ;;  %997 = vmatmul.msk.f32.gmra.mxu3 %vm369_vm1, %v355_v16  ;;  %v312_v54 = vld [vmem:[%s1177_s13 + $0x60] sm:$0xff]  ;;  %v349_v57 = vld [vmem:[%s1170_s10 + $0x68] sm:$0xff]  ;;  %v350_v61 = vld [vmem:[%s1170_s10 + $0x70] sm:$0xff] }
  0x21   : > { %v328_v55 = vld [vmem:[%s1177_s13 + $0xe0] sm:$0xff]  ;;  %v313_v58 = vld [vmem:[%s1177_s13 + $0x68] sm:$0xff]  ;;  %v314_v62 = vld [vmem:[%s1177_s13 + $0x70] sm:$0xff] }
  0x22   : > { %v329_v59 = vld [vmem:[%s1177_s13 + $0xe8] sm:$0xff]  ;;  %v330_v63 = vld [vmem:[%s1177_s13 + $0xf0] sm:$0xff]  ;;  %v367_v0 = vld [vmem:[%s1170_s10 + $0xf8] sm:$0xff] }
  0x23   : > { %v351_v1 = vld [vmem:[%s1170_s10 + $0x78] sm:$0xff]  ;;  %v1307_v5 = vld [vmem:[%s1429_s4] ss:$0 sm:$0xff] }
  0x24   : > { %1012 = vmatmul.msk.f32.gmra.mxu1 %vm583_vm2, %v302_v14  ;;  %1028 = vmatmul.msk.f32.gmra.mxu2 %vm583_vm2, %v318_v15  ;;  %v315_v2 = vld [vmem:[%s1177_s13 + $0x78] sm:$0xff]  ;;  %v352_v6 = vld [vmem:[%s1170_s10 + $0x80] sm:$0xff] }
  0x25   : > { %v331_v3 = vld [vmem:[%s1177_s13 + $0xf8] sm:$0xff] }
  0x28   : > { %981 = vmatmul.msk.f32.gmra.mxu0 %vm369_vm1, %v339_v17  ;;  %998 = vmatmul.msk.f32.gmra.mxu3 %vm369_vm1, %v356_v20 }
  0x2c   : > { %1013 = vmatmul.msk.f32.gmra.mxu1 %vm583_vm2, %v303_v18  ;;  %1029 = vmatmul.msk.f32.gmra.mxu2 %vm583_vm2, %v319_v19 }
  0x30   : > { %982 = vmatmul.msk.f32.gmra.mxu0 %vm369_vm1, %v340_v21  ;;  %999 = vmatmul.msk.f32.gmra.mxu3 %vm369_vm1, %v357_v24 }
  0x34   : > { %1014 = vmatmul.msk.f32.gmra.mxu1 %vm583_vm2, %v304_v22  ;;  %1030 = vmatmul.msk.f32.gmra.mxu2 %vm583_vm2, %v320_v23 }
  0x38   : > { %983 = vmatmul.msk.f32.gmra.mxu0 %vm369_vm1, %v341_v25  ;;  %1000 = vmatmul.msk.f32.gmra.mxu3 %vm369_vm1, %v358_v28 }
  0x3c   : > { %1015 = vmatmul.msk.f32.gmra.mxu1 %vm583_vm2, %v305_v26  ;;  %1031 = vmatmul.msk.f32.gmra.mxu2 %vm583_vm2, %v321_v27 }
  0x40   : > { %984 = vmatmul.msk.f32.gmra.mxu0 %vm369_vm1, %v342_v29  ;;  %1001 = vmatmul.msk.f32.gmra.mxu3 %vm369_vm1, %v359_v32 }
  0x44   : > { %1016 = vmatmul.msk.f32.gmra.mxu1 %vm583_vm2, %v306_v30  ;;  %1032 = vmatmul.msk.f32.gmra.mxu2 %vm583_vm2, %v322_v31 }
  0x48   : > { %985 = vmatmul.msk.f32.gmra.mxu0 %vm369_vm1, %v343_v33  ;;  %1002 = vmatmul.msk.f32.gmra.mxu3 %vm369_vm1, %v360_v36 }
  0x4c   : > { %1017 = vmatmul.msk.f32.gmra.mxu1 %vm583_vm2, %v307_v34  ;;  %1033 = vmatmul.msk.f32.gmra.mxu2 %vm583_vm2, %v323_v35 }
  0x50   : > { %986 = vmatmul.msk.f32.gmra.mxu0 %vm369_vm1, %v344_v37  ;;  %1003 = vmatmul.msk.f32.gmra.mxu3 %vm369_vm1, %v361_v40 }
  0x54   : > { %1018 = vmatmul.msk.f32.gmra.mxu1 %vm583_vm2, %v308_v38  ;;  %1034 = vmatmul.msk.f32.gmra.mxu2 %vm583_vm2, %v324_v39 }
  0x58   : > { %987 = vmatmul.msk.f32.gmra.mxu0 %vm369_vm1, %v345_v41  ;;  %1004 = vmatmul.msk.f32.gmra.mxu3 %vm369_vm1, %v362_v44 }
  0x5c   : > { %1019 = vmatmul.msk.f32.gmra.mxu1 %vm583_vm2, %v309_v42  ;;  %1035 = vmatmul.msk.f32.gmra.mxu2 %vm583_vm2, %v325_v43 }
  0x60   : > { %988 = vmatmul.msk.f32.gmra.mxu0 %vm369_vm1, %v346_v45  ;;  %1005 = vmatmul.msk.f32.gmra.mxu3 %vm369_vm1, %v363_v48 }
  0x64   : > { %1020 = vmatmul.msk.f32.gmra.mxu1 %vm583_vm2, %v310_v46  ;;  %1036 = vmatmul.msk.f32.gmra.mxu2 %vm583_vm2, %v326_v47 }
  0x68   : > { %989 = vmatmul.msk.f32.gmra.mxu0 %vm369_vm1, %v347_v49  ;;  %1006 = vmatmul.msk.f32.gmra.mxu3 %vm369_vm1, %v364_v52 }
  0x6c   : > { %1021 = vmatmul.msk.f32.gmra.mxu1 %vm583_vm2, %v311_v50  ;;  %1037 = vmatmul.msk.f32.gmra.mxu2 %vm583_vm2, %v327_v51 }
  0x70   : > { %990 = vmatmul.msk.f32.gmra.mxu0 %vm369_vm1, %v348_v53  ;;  %1007 = vmatmul.msk.f32.gmra.mxu3 %vm369_vm1, %v365_v56 }
  0x74   : > { %1022 = vmatmul.msk.f32.gmra.mxu1 %vm583_vm2, %v312_v54  ;;  %1038 = vmatmul.msk.f32.gmra.mxu2 %vm583_vm2, %v328_v55 }
  0x78   : > { %991 = vmatmul.msk.f32.gmra.mxu0 %vm369_vm1, %v349_v57  ;;  %1008 = vmatmul.msk.f32.gmra.mxu3 %vm369_vm1, %v366_v60 }
  0x7c   : > { %1023 = vmatmul.msk.f32.gmra.mxu1 %vm583_vm2, %v313_v58  ;;  %1039 = vmatmul.msk.f32.gmra.mxu2 %vm583_vm2, %v329_v59 }
  0x80   : > { %992 = vmatmul.msk.f32.gmra.mxu0 %vm369_vm1, %v350_v61  ;;  %1009 = vmatmul.msk.f32.gmra.mxu3 %vm369_vm1, %v367_v0 }
  0x84   : > { %1024 = vmatmul.msk.f32.gmra.mxu1 %vm583_vm2, %v314_v62  ;;  %1040 = vmatmul.msk.f32.gmra.mxu2 %vm583_vm2, %v330_v63 }
  0x88   : > { %993 = vmatmul.msk.f32.gmra.mxu0 %vm369_vm1, %v351_v1 }
  0x8c   : > { %1025 = vmatmul.msk.f32.gmra.mxu1 %vm583_vm2, %v315_v2  ;;  %1041 = vmatmul.msk.f32.gmra.mxu2 %vm583_vm2, %v331_v3 }
  0x8d   : > { %v487_v4 = vpop.f32.mrf.mxu0 }
  0x90   : > { %994 = vmatmul.msk.f32.gmra.mxu0 %vm369_vm1, %v352_v6 }
  0x91   : > { %v697_v7 = vpop.f32.mrf.mxu1 }
  0x92   : > { %v698_v8 = vadd.f32 %v697_v7, %v487_v4 }
  0x93   : > { %v538_v13 = vpop.f32.mrf.mxu3 }
  0x94   : > { %v797_v9 = vadd.f32 %v1307_v5, %v698_v8 }
  0x95   : > { %v490_v10 = vpop.f32.mrf.mxu0 }
  0x96   : > { %829 = vst.msk [vmem:[%s1314_s18] sm:$0xff] %vm369_vm1, %v797_v9 }
  0x97   : > { %v1320_v11 = vpop.f32.mrf.mxu2 }
  0x99   : > { %v700_v12 = vpop.f32.mrf.mxu1 }
  0x9a   : > { %v701_v14 = vadd.f32 %v700_v12, %v490_v10 }
  0x9b   : > { %v541_v20 = vpop.f32.mrf.mxu3 }
  0x9c   : > { %v798_v15 = vadd.f32 %v1307_v5, %v701_v14 }
  0x9d   : > { %v493_v16 = vpop.f32.mrf.mxu0 }
  0x9e   : > { %830 = vst.msk [vmem:[%s1314_s18 + $0x8] sm:$0xff] %vm369_vm1, %v798_v15 }
  0x9f   : > { %v748_v17 = vpop.f32.mrf.mxu2 }
  0xa0   : > { %v749_v18 = vadd.f32 %v748_v17, %v538_v13 }
  0xa1   : > { %v703_v19 = vpop.f32.mrf.mxu1 }
  0xa2   : > { %v704_v21 = vadd.f32 %v703_v19, %v493_v16  ;;  %v814_v22 = vadd.f32 %v1307_v5, %v749_v18 }
  0xa3   : > { %v544_v28 = vpop.f32.mrf.mxu3 }
  0xa4   : > { %v799_v23 = vadd.f32 %v1307_v5, %v704_v21  ;;  %846 = vst.msk [vmem:[%s1314_s18 + $0x88] sm:$0xff] %vm369_vm1, %v814_v22 }
  0xa5   : > { %v496_v24 = vpop.f32.mrf.mxu0 }
  0xa6   : > { %831 = vst.msk [vmem:[%s1314_s18 + $0x10] sm:$0xff] %vm369_vm1, %v799_v23 }
  0xa7   : > { %v751_v25 = vpop.f32.mrf.mxu2 }
  0xa8   : > { %v752_v26 = vadd.f32 %v751_v25, %v541_v20 }
  0xa9   : > { %v706_v27 = vpop.f32.mrf.mxu1 }
  0xaa   : > { %v707_v29 = vadd.f32 %v706_v27, %v496_v24  ;;  %v815_v30 = vadd.f32 %v1307_v5, %v752_v26 }
  0xab   : > { %v547_v36 = vpop.f32.mrf.mxu3 }
  0xac   : > { %v800_v31 = vadd.f32 %v1307_v5, %v707_v29  ;;  %847 = vst.msk [vmem:[%s1314_s18 + $0x90] sm:$0xff] %vm369_vm1, %v815_v30 }
  0xad   : > { %v499_v32 = vpop.f32.mrf.mxu0 }
  0xae   : > { %832 = vst.msk [vmem:[%s1314_s18 + $0x18] sm:$0xff] %vm369_vm1, %v800_v31 }
  0xaf   : > { %v754_v33 = vpop.f32.mrf.mxu2 }
  0xb0   : > { %v755_v34 = vadd.f32 %v754_v33, %v544_v28 }
  0xb1   : > { %v709_v35 = vpop.f32.mrf.mxu1 }
  0xb2   : > { %v710_v37 = vadd.f32 %v709_v35, %v499_v32  ;;  %v816_v38 = vadd.f32 %v1307_v5, %v755_v34 }
  0xb3   : > { %v550_v44 = vpop.f32.mrf.mxu3 }
  0xb4   : > { %v801_v39 = vadd.f32 %v1307_v5, %v710_v37  ;;  %848 = vst.msk [vmem:[%s1314_s18 + $0x98] sm:$0xff] %vm369_vm1, %v816_v38 }
  0xb5   : > { %v502_v40 = vpop.f32.mrf.mxu0 }
  0xb6   : > { %833 = vst.msk [vmem:[%s1314_s18 + $0x20] sm:$0xff] %vm369_vm1, %v801_v39 }
  0xb7   : > { %v757_v41 = vpop.f32.mrf.mxu2 }
  0xb8   : > { %v758_v42 = vadd.f32 %v757_v41, %v547_v36 }
  0xb9   : > { %v712_v43 = vpop.f32.mrf.mxu1 }
  0xba   : > { %v713_v45 = vadd.f32 %v712_v43, %v502_v40  ;;  %v817_v46 = vadd.f32 %v1307_v5, %v758_v42 }
  0xbb   : > { %v553_v52 = vpop.f32.mrf.mxu3 }
  0xbc   : > { %v802_v47 = vadd.f32 %v1307_v5, %v713_v45  ;;  %849 = vst.msk [vmem:[%s1314_s18 + $0xa0] sm:$0xff] %vm369_vm1, %v817_v46 }
  0xbd   : > { %v505_v48 = vpop.f32.mrf.mxu0 }
  0xbe   : > { %834 = vst.msk [vmem:[%s1314_s18 + $0x28] sm:$0xff] %vm369_vm1, %v802_v47 }
  0xbf   : > { %v760_v49 = vpop.f32.mrf.mxu2 }
  0xc0   : > { %v761_v50 = vadd.f32 %v760_v49, %v550_v44 }
  0xc1   : > { %v715_v51 = vpop.f32.mrf.mxu1 }
  0xc2   : > { %v716_v53 = vadd.f32 %v715_v51, %v505_v48  ;;  %v818_v54 = vadd.f32 %v1307_v5, %v761_v50 }
  0xc3   : > { %v556_v60 = vpop.f32.mrf.mxu3 }
  0xc4   : > { %v803_v55 = vadd.f32 %v1307_v5, %v716_v53  ;;  %850 = vst.msk [vmem:[%s1314_s18 + $0xa8] sm:$0xff] %vm369_vm1, %v818_v54 }
  0xc5   : > { %v508_v56 = vpop.f32.mrf.mxu0 }
  0xc6   : > { %835 = vst.msk [vmem:[%s1314_s18 + $0x30] sm:$0xff] %vm369_vm1, %v803_v55 }
  0xc7   : > { %v763_v57 = vpop.f32.mrf.mxu2 }
  0xc8   : > { %v764_v58 = vadd.f32 %v763_v57, %v553_v52 }
  0xc9   : > { %v718_v59 = vpop.f32.mrf.mxu1 }
  0xca   : > { %v719_v61 = vadd.f32 %v718_v59, %v508_v56  ;;  %v819_v62 = vadd.f32 %v1307_v5, %v764_v58 }
  0xcb   : > { %v559_v4 = vpop.f32.mrf.mxu3 }
  0xcc   : > { %v804_v63 = vadd.f32 %v1307_v5, %v719_v61  ;;  %851 = vst.msk [vmem:[%s1314_s18 + $0xb0] sm:$0xff] %vm369_vm1, %v819_v62 }
  0xcd   : > { %v511_v0 = vpop.f32.mrf.mxu0 }
  0xce   : > { %836 = vst.msk [vmem:[%s1314_s18 + $0x38] sm:$0xff] %vm369_vm1, %v804_v63 }
  0xcf   : > { %v766_v1 = vpop.f32.mrf.mxu2 }
  0xd0   : > { %v767_v2 = vadd.f32 %v766_v1, %v556_v60 }
  0xd1   : > { %v721_v3 = vpop.f32.mrf.mxu1 }
  0xd2   : > { %v722_v6 = vadd.f32 %v721_v3, %v511_v0  ;;  %v820_v7 = vadd.f32 %v1307_v5, %v767_v2 }
  0xd3   : > { %v562_v14 = vpop.f32.mrf.mxu3 }
  0xd4   : > { %v805_v8 = vadd.f32 %v1307_v5, %v722_v6  ;;  %852 = vst.msk [vmem:[%s1314_s18 + $0xb8] sm:$0xff] %vm369_vm1, %v820_v7 }
  0xd5   : > { %v514_v9 = vpop.f32.mrf.mxu0 }
  0xd6   : > { %837 = vst.msk [vmem:[%s1314_s18 + $0x40] sm:$0xff] %vm369_vm1, %v805_v8 }
  0xd7   : > { %v769_v10 = vpop.f32.mrf.mxu2 }
  0xd8   : > { %v770_v12 = vadd.f32 %v769_v10, %v559_v4 }
  0xd9   : > { %v724_v13 = vpop.f32.mrf.mxu1 }
  0xda   : > { %v725_v15 = vadd.f32 %v724_v13, %v514_v9  ;;  %v821_v16 = vadd.f32 %v1307_v5, %v770_v12 }
  0xdb   : > { %v565_v22 = vpop.f32.mrf.mxu3 }
  0xdc   : > { %v806_v17 = vadd.f32 %v1307_v5, %v725_v15  ;;  %853 = vst.msk [vmem:[%s1314_s18 + $0xc0] sm:$0xff] %vm369_vm1, %v821_v16 }
  0xdd   : > { %v517_v18 = vpop.f32.mrf.mxu0 }
  0xde   : > { %838 = vst.msk [vmem:[%s1314_s18 + $0x48] sm:$0xff] %vm369_vm1, %v806_v17 }
  0xdf   : > { %v772_v19 = vpop.f32.mrf.mxu2 }
  0xe0   : > { %v773_v20 = vadd.f32 %v772_v19, %v562_v14 }
  0xe1   : > { %v727_v21 = vpop.f32.mrf.mxu1 }
  0xe2   : > { %v728_v23 = vadd.f32 %v727_v21, %v517_v18  ;;  %v822_v24 = vadd.f32 %v1307_v5, %v773_v20 }
  0xe3   : > { %v568_v30 = vpop.f32.mrf.mxu3 }
  0xe4   : > { %v807_v25 = vadd.f32 %v1307_v5, %v728_v23  ;;  %854 = vst.msk [vmem:[%s1314_s18 + $0xc8] sm:$0xff] %vm369_vm1, %v822_v24 }
  0xe5   : > { %v520_v26 = vpop.f32.mrf.mxu0 }
  0xe6   : > { %839 = vst.msk [vmem:[%s1314_s18 + $0x50] sm:$0xff] %vm369_vm1, %v807_v25 }
  0xe7   : > { %v775_v27 = vpop.f32.mrf.mxu2 }
  0xe8   : > { %v776_v28 = vadd.f32 %v775_v27, %v565_v22 }
  0xe9   : > { %v730_v29 = vpop.f32.mrf.mxu1 }
  0xea   : > { %v731_v31 = vadd.f32 %v730_v29, %v520_v26  ;;  %v823_v32 = vadd.f32 %v1307_v5, %v776_v28 }
  0xeb   : > { %v571_v38 = vpop.f32.mrf.mxu3 }
  0xec   : > { %v808_v33 = vadd.f32 %v1307_v5, %v731_v31  ;;  %855 = vst.msk [vmem:[%s1314_s18 + $0xd0] sm:$0xff] %vm369_vm1, %v823_v32 }
  0xed   : > { %v523_v34 = vpop.f32.mrf.mxu0 }
  0xee   : > { %840 = vst.msk [vmem:[%s1314_s18 + $0x58] sm:$0xff] %vm369_vm1, %v808_v33 }
  0xef   : > { %v778_v35 = vpop.f32.mrf.mxu2 }
  0xf0   : > { %v779_v36 = vadd.f32 %v778_v35, %v568_v30 }
  0xf1   : > { %v733_v37 = vpop.f32.mrf.mxu1 }
  0xf2   : > { %v734_v39 = vadd.f32 %v733_v37, %v523_v34  ;;  %v824_v40 = vadd.f32 %v1307_v5, %v779_v36 }
  0xf3   : > { %v574_v47 = vpop.f32.mrf.mxu3 }
  0xf4   : > { %v809_v41 = vadd.f32 %v1307_v5, %v734_v39  ;;  %856 = vst.msk [vmem:[%s1314_s18 + $0xd8] sm:$0xff] %vm369_vm1, %v824_v40 }
  0xf5   : > { %v526_v42 = vpop.f32.mrf.mxu0 }
  0xf6   : > { %841 = vst.msk [vmem:[%s1314_s18 + $0x60] sm:$0xff] %vm369_vm1, %v809_v41 }
  0xf7   : > { %v781_v43 = vpop.f32.mrf.mxu2 }
  0xf8   : > { %v782_v44 = vadd.f32 %v781_v43, %v571_v38 }
  0xf9   : > { %v736_v45 = vpop.f32.mrf.mxu1 }
  0xfa   : > { %v737_v46 = vadd.f32 %v736_v45, %v526_v42  ;;  %v825_v48 = vadd.f32 %v1307_v5, %v782_v44 }
  0xfb   : > { %v577_v57 = vpop.f32.mrf.mxu3 }
  0xfc   : > { %v810_v49 = vadd.f32 %v1307_v5, %v737_v46  ;;  %857 = vst.msk [vmem:[%s1314_s18 + $0xe0] sm:$0xff] %vm369_vm1, %v825_v48 }
  0xfd   : > { %v529_v50 = vpop.f32.mrf.mxu0 }
  0xfe   : > { %842 = vst.msk [vmem:[%s1314_s18 + $0x68] sm:$0xff] %vm369_vm1, %v810_v49 }
  0xff   : > { %v784_v51 = vpop.f32.mrf.mxu2 }
 0x100   : > { %v785_v52 = vadd.f32 %v784_v51, %v574_v47 }
 0x101   : > { %v739_v53 = vpop.f32.mrf.mxu1 }
 0x102   : > { %v740_v54 = vadd.f32 %v739_v53, %v529_v50  ;;  %v826_v55 = vadd.f32 %v1307_v5, %v785_v52 }
 0x103   : > { %v580_v1 = vpop.f32.mrf.mxu3 }
 0x104   : > { %v811_v56 = vadd.f32 %v1307_v5, %v740_v54  ;;  %858 = vst.msk [vmem:[%s1314_s18 + $0xe8] sm:$0xff] %vm369_vm1, %v826_v55 }
 0x105   : > { %v532_v58 = vpop.f32.mrf.mxu0 }
 0x106   : > { %843 = vst.msk [vmem:[%s1314_s18 + $0x70] sm:$0xff] %vm369_vm1, %v811_v56 }
 0x107   : > { %v787_v59 = vpop.f32.mrf.mxu2 }
 0x108   : > { %v788_v60 = vadd.f32 %v787_v59, %v577_v57 }
 0x109   : > { %v742_v61 = vpop.f32.mrf.mxu1 }
 0x10a   : > { %v743_v62 = vadd.f32 %v742_v61, %v532_v58  ;;  %v827_v63 = vadd.f32 %v1307_v5, %v788_v60 }
 0x10c   : > { %v812_v0 = vadd.f32 %v1307_v5, %v743_v62  ;;  %859 = vst.msk [vmem:[%s1314_s18 + $0xf0] sm:$0xff] %vm369_vm1, %v827_v63 }
 0x10d   : > { %v535_v2 = vpop.f32.mrf.mxu0 }
 0x10e   : > { %844 = vst.msk [vmem:[%s1314_s18 + $0x78] sm:$0xff] %vm369_vm1, %v812_v0  ;;  %v746_v4 = vadd.f32 %v1320_v11, %v535_v2 }
 0x10f   : > { %v790_v3 = vpop.f32.mrf.mxu2 }
 0x110   : > { %v791_v6 = vadd.f32 %v790_v3, %v580_v1  ;;  %v813_v7 = vadd.f32 %v1307_v5, %v746_v4 }
 0x112   : > { %v828_v8 = vadd.f32 %v1307_v5, %v791_v6  ;;  %845 = vst.msk [vmem:[%s1314_s18 + $0x80] sm:$0xff] %vm369_vm1, %v813_v7 }
 0x114   : > { %860 = vst.msk [vmem:[%s1314_s18 + $0xf8] sm:$0xff] %vm369_vm1, %v828_v8 }
 0x115 PF: > { %s15_s20 = sadd.s32 1, %s1099_s20   ;;  %s1431_s18 = smov %s1095_s19 }
 0x116   : > { %p12_p5 = scmp.ge.s32.totalorder %s15_s20, 4   ;;  %s1432_s19 = smov %s1434_s21 }
 0x118   :  { %14 = sbr.rel (!%p12_p5) target bundleno = 2 (0x2), region = 73 }

</bundles_post_ra>
